<compile_context>
chip_gen: v7x
topology: tpu7x:2x2x1
jax: 0.10.0
libtpu: 0.0.40
codegen_flags: <defaults>
</compile_context>

<pallas_src>
import jax
import jax.numpy as jnp
from jax.experimental import pallas as pl
from jax.experimental.pallas import tpu as pltpu


def _round_up(v, m):
    return ((v + m - 1) // m) * m


def multigraph_forward(x, edge_index, edge_attr, params, *, edges_per_block=128):
    """Equivalent of MultigraphWrapper(model)(x, edge_index, edge_attr)."""
    N, F = x.shape
    E = edge_index.shape[1]
    EDGE_DIM = edge_attr.shape[1]
    HIDDEN = params["w1"].shape[1]
    OUT = params["w2"].shape[1]

    te = edges_per_block
    assert te % 128 == 0, "edges_per_block must be a multiple of 128 (lane width)"
    n_pad = _round_up(N, 8)
    f_pad = _round_up(F, 128)
    h_pad = _round_up(HIDDEN, 128)
    o_pad = _round_up(OUT, 128)
    num_blocks = _round_up(E, te) // te
    e_pad = num_blocks * te

    f32, bf16 = jnp.float32, jnp.bfloat16

    def pad2(a, rows, cols, dtype=f32):
        a = jnp.asarray(a, f32)
        out = jnp.zeros((rows, cols), f32).at[: a.shape[0], : a.shape[1]].set(a)
        return out.astype(dtype)

    # ---- glue: what the wrapper / Data construction does --------------------
    # data.batch = zeros(N) -> single graph => full-graph mean pool in-kernel.
    # data.n_idx = arange(N) -> not consumed by this model.
    x_p = pad2(x, n_pad, f_pad)                                  # f32 (node-update path)
    we_p = pad2(params["w_e"], EDGE_DIM, f_pad)                  # f32 (VPU rank-1)
    be_p = pad2(jnp.reshape(params["b_e"], (1, -1)), 1, f_pad)
    w1_p = pad2(params["w1"], f_pad, h_pad, bf16)                # bf16 (MXU)
    b1_p = pad2(jnp.reshape(params["b1"], (1, -1)), 1, h_pad)
    w2_p = pad2(params["w2"], h_pad, o_pad, bf16)                # bf16 (MXU)
    b2_p = pad2(jnp.reshape(params["b2"], (1, -1)), 1, o_pad)

    ea_p = pad2(edge_attr, e_pad, EDGE_DIM)                      # (e_pad, EDGE_DIM) f32
    # src as a column (sublane axis), dst as a row (lane axis): both feed
    # iota==index one-hot masks with plain ((1,),(0,)) matmuls (no transposes).
    # Padded edges get dst = -1 -> all-zero one-hot column -> contribute nothing.
    src_p = jnp.zeros((e_pad, 1), jnp.int32).at[:E, 0].set(
        edge_index[0].astype(jnp.int32))
    dst_p = jnp.full((1, e_pad), -1, jnp.int32).at[0, :E].set(
        edge_index[1].astype(jnp.int32))

    inv_n = 1.0 / N

    def kernel(src_ref, dst_ref, x_ref, ea_ref, we_ref, be_ref,
               w1_ref, b1_ref, w2_ref, b2_ref,
               out_ref, agg_ref, xb_ref):
        eb = pl.program_id(0)

        @pl.when(eb == 0)
        def _init():
            agg_ref[...] = jnp.zeros_like(agg_ref)
            xb_ref[...] = x_ref[...].astype(bf16)      # resident bf16 copy for gathers

        base = pl.multiple_of(eb * te, te)

        # 1. edge embedding for this edge block (K = EDGE_DIM is tiny -> rank-1
        #    VPU broadcast-adds; MXU is busy with the gather/scatter matmuls).
        ea = ea_ref[pl.ds(base, te), :]                           # (te, EDGE_DIM) f32
        we = we_ref[...]                                          # (EDGE_DIM, f_pad)
        e_emb = be_ref[...]                                       # (1, f_pad)
        for k in range(EDGE_DIM):
            e_emb = e_emb + ea[:, k:k + 1] * we[k:k + 1, :]
        e_emb = jnp.maximum(e_emb, 0.0)                           # (te, f_pad) f32

        # 2. one-hot gather of source node features (MXU).
        src_col = src_ref[pl.ds(base, te), :]                     # (te, 1) int32
        dst_row = dst_ref[:, pl.ds(base, te)]                     # (1, te) int32
        lane_iota = jax.lax.broadcasted_iota(jnp.int32, (te, n_pad), 1)
        s_src = jnp.where(lane_iota == src_col, 1.0, 0.0).astype(bf16)   # (te, n_pad)
        x_src = jnp.dot(s_src, xb_ref[...],
                        preferred_element_type=jnp.float32)       # (te, f_pad) f32

        # 3. message.
        msg = jnp.maximum(x_src + e_emb, 0.0).astype(bf16)        # (te, f_pad) bf16

        # 4. one-hot scatter-add to destination nodes (MXU, f32 accumulation;
        #    duplicate destinations within a block sum naturally).
        sub_iota = jax.lax.broadcasted_iota(jnp.int32, (n_pad, te), 0)
        s_dst_t = jnp.where(sub_iota == dst_row, 1.0, 0.0).astype(bf16)  # (n_pad, te)
        agg_ref[...] += jnp.dot(s_dst_t, msg,
                                preferred_element_type=jnp.float32)      # (n_pad, f_pad)

        # 5-7. node update, mean pool (batch == zeros), readout — last block.
        @pl.when(eb == pl.num_programs(0) - 1)
        def _finalize():
            h_in = x_ref[...] + agg_ref[...]                      # (n_pad, f_pad) f32
            h = jnp.dot(h_in.astype(bf16), w1_ref[...],
                        preferred_element_type=jnp.float32) + b1_ref[...]
            h = jnp.maximum(h, 0.0)                               # (n_pad, h_pad)
            row = jax.lax.broadcasted_iota(jnp.int32, (n_pad, 1), 0)
            h = jnp.where(row < N, h, 0.0)                        # drop padded node rows
            pooled = jnp.sum(h, axis=0, keepdims=True) * inv_n    # (1, h_pad)
            out_ref[...] = jnp.dot(pooled.astype(bf16), w2_ref[...],
                                   preferred_element_type=jnp.float32) + b2_ref[...]

    # Rough VMEM footprint (inputs/outputs double-buffered by the pipeline even
    # with constant index_maps) -> derive the limit instead of hard-coding it.
    def _est_vmem_bytes():
        def arr(rows, cols, itemsize):
            return _round_up(rows, 8) * _round_up(cols, 128) * itemsize
        resident = (arr(n_pad, f_pad, 4) + arr(e_pad, EDGE_DIM, 4)
                    + arr(e_pad, 1, 4) + arr(1, e_pad, 4)
                    + arr(EDGE_DIM, f_pad, 4) + arr(1, f_pad, 4)
                    + arr(f_pad, h_pad, 2) + arr(1, h_pad, 4)
                    + arr(h_pad, o_pad, 2) + arr(1, o_pad, 4)
                    + arr(1, o_pad, 4))
        scratch = arr(n_pad, f_pad, 4) + arr(n_pad, f_pad, 2)
        return 2 * resident + scratch

    vmem_limit = int(min(64 << 20, max(16 << 20, 4 * _est_vmem_bytes())))

    grid_spec = pltpu.PrefetchScalarGridSpec(
        num_scalar_prefetch=0,
        grid=(num_blocks,),
        in_specs=[
            pl.BlockSpec((e_pad, 1), lambda i: (0, 0)),           # src (resident)
            pl.BlockSpec((1, e_pad), lambda i: (0, 0)),           # dst (resident)
            pl.BlockSpec((n_pad, f_pad), lambda i: (0, 0)),       # x   (resident)
            pl.BlockSpec((e_pad, EDGE_DIM), lambda i: (0, 0)),    # edge_attr (resident)
            pl.BlockSpec((EDGE_DIM, f_pad), lambda i: (0, 0)),    # w_e
            pl.BlockSpec((1, f_pad), lambda i: (0, 0)),           # b_e
            pl.BlockSpec((f_pad, h_pad), lambda i: (0, 0)),       # w1
            pl.BlockSpec((1, h_pad), lambda i: (0, 0)),           # b1
            pl.BlockSpec((h_pad, o_pad), lambda i: (0, 0)),       # w2
            pl.BlockSpec((1, o_pad), lambda i: (0, 0)),           # b2
        ],
        out_specs=pl.BlockSpec((1, o_pad), lambda i: (0, 0)),
        scratch_shapes=[pltpu.VMEM((n_pad, f_pad), jnp.float32),   # agg accumulator
                        pltpu.VMEM((n_pad, f_pad), jnp.bfloat16)], # bf16 copy of x
    )

    out_p = pl.pallas_call(
        kernel,
        out_shape=jax.ShapeDtypeStruct((1, o_pad), jnp.float32),
        grid_spec=grid_spec,
        compiler_params=pltpu.CompilerParams(
            dimension_semantics=("arbitrary",),   # edge axis carries the accumulator
            vmem_limit_bytes=vmem_limit,
        ),
    )(src_p, dst_p, x_p, ea_p, we_p, be_p, w1_p, b1_p, w2_p, b2_p)

    # TODO(synk): at production scale, (a) batch many graphs along a leading
    # "parallel" grid axis (block-diagonal adjacency) so v7x's 2 TCs are used,
    # the finalize matmuls get M >= 256, and per-call overhead is amortized;
    # (b) stream edge_attr/src/dst tiles instead of keeping them resident once
    # E gets large.
    return out_p[:, :OUT]


def reference_forward(x, edge_index, edge_attr, params):
    """Pure-JAX reference with matched numerics (bf16 message path + bf16 MXU
    operands, f32 accumulation everywhere)."""
    f32, bf16 = jnp.float32, jnp.bfloat16
    hi = jax.lax.Precision.HIGHEST
    N, F = x.shape
    src, dst = edge_index[0], edge_index[1]
    e_emb = jnp.maximum(
        jnp.dot(edge_attr, params["w_e"], precision=hi) + params["b_e"], 0.0)
    x_b = x.astype(bf16).astype(f32)                    # bf16 node features for messages
    msg = jnp.maximum(x_b[src] + e_emb, 0.0)
    msg_b = msg.astype(bf16).astype(f32)                # bf16 messages, f32 accumulation
    agg = jnp.zeros((N, F), f32).at[dst].add(msg_b)
    h = jnp.maximum(
        jnp.dot((x + agg).astype(bf16), params["w1"].astype(bf16),
                preferred_element_type=f32) + params["b1"], 0.0)
    pooled = jnp.mean(h, axis=0, keepdims=True)
    return jnp.dot(pooled.astype(bf16), params["w2"].astype(bf16),
                   preferred_element_type=f32) + params["b2"]


if __name__ == "__main__":
    # Small deterministic problem sizes implied by the forward signature.
    # E=300 with edges_per_block=128 -> 3 edge blocks, exercising accumulation.
    N, F, E, EDGE_DIM, HIDDEN, OUT = 16, 32, 300, 4, 32, 8

    key = jax.random.PRNGKey(0)
    k_x, k_ei, k_ea, k_we, k_w1, k_w2 = jax.random.split(key, 6)

    x = jax.random.normal(k_x, (N, F), dtype=jnp.float32)
    edge_index = jax.random.randint(k_ei, (2, E), 0, N, dtype=jnp.int32)
    edge_attr = jax.random.normal(k_ea, (E, EDGE_DIM), dtype=jnp.float32)

    params = {
        "w_e": jax.random.normal(k_we, (EDGE_DIM, F), jnp.float32) * 0.1,
        "b_e": jnp.zeros((1, F), jnp.float32),
        "w1": jax.random.normal(k_w1, (F, HIDDEN), jnp.float32) * 0.1,
        "b1": jnp.zeros((1, HIDDEN), jnp.float32),
        "w2": jax.random.normal(k_w2, (HIDDEN, OUT), jnp.float32) * 0.1,
        "b2": jnp.zeros((1, OUT), jnp.float32),
    }

    # Validity check (out-of-range indices are silently dropped by the one-hot
    # masks in both the kernel and the reference, so this is informational).
    assert int(jnp.min(edge_index)) >= 0 and int(jnp.max(edge_index)) < N

    out = multigraph_forward(x, edge_index, edge_attr, params)
    out = jax.block_until_ready(out)

    ref = reference_forward(x, edge_index, edge_attr, params)
    assert out.shape == (1, OUT)
    # Both sides: bf16 gather/message/scatter operands with f32 accumulation and
    # bf16 MXU matmuls; 2e-3 covers accumulation-order / bf16 boundary rounding.
    assert jnp.allclose(out, ref, rtol=2e-3, atol=2e-3), (out, ref)

    print("KERNEL_OK")
</pallas_src>

<mosaic_0001>
module attributes {stable_mosaic.version = 11 : i64} {
  func.func @kernel(%arg0: i32, %arg1: memref<384x1xi32, #tpu.memory_space<vmem>>, %arg2: memref<1x384xi32, #tpu.memory_space<vmem>>, %arg3: memref<16x128xf32, #tpu.memory_space<vmem>>, %arg4: memref<384x4xf32, #tpu.memory_space<vmem>>, %arg5: memref<4x128xf32, #tpu.memory_space<vmem>>, %arg6: memref<1x128xf32, #tpu.memory_space<vmem>>, %arg7: memref<128x128xbf16, #tpu.memory_space<vmem>>, %arg8: memref<1x128xf32, #tpu.memory_space<vmem>>, %arg9: memref<128x128xbf16, #tpu.memory_space<vmem>>, %arg10: memref<1x128xf32, #tpu.memory_space<vmem>>, %arg11: memref<1x128xf32, #tpu.memory_space<vmem>>, %arg12: memref<16x128xf32, #tpu.memory_space<vmem>>, %arg13: memref<16x128xbf16, #tpu.memory_space<vmem>>) attributes {dimension_semantics = [#tpu.dimension_semantics<arbitrary>], iteration_bounds = array<i64: 3>, scalar_prefetch = 0 : i64, scratch_operands = 2 : i64, tpu.core_type = #tpu.core_type<tc>, window_params = [{pipeline_mode = #tpu.pipeline_mode<synchronous>, transform_indices = @transform_0, window_bounds = array<i64: 384, 1>}, {pipeline_mode = #tpu.pipeline_mode<synchronous>, transform_indices = @transform_1, window_bounds = array<i64: 1, 384>}, {pipeline_mode = #tpu.pipeline_mode<synchronous>, transform_indices = @transform_2, window_bounds = array<i64: 16, 128>}, {pipeline_mode = #tpu.pipeline_mode<synchronous>, transform_indices = @transform_3, window_bounds = array<i64: 384, 4>}, {pipeline_mode = #tpu.pipeline_mode<synchronous>, transform_indices = @transform_4, window_bounds = array<i64: 4, 128>}, {pipeline_mode = #tpu.pipeline_mode<synchronous>, transform_indices = @transform_5, window_bounds = array<i64: 1, 128>}, {pipeline_mode = #tpu.pipeline_mode<synchronous>, transform_indices = @transform_6, window_bounds = array<i64: 128, 128>}, {pipeline_mode = #tpu.pipeline_mode<synchronous>, transform_indices = @transform_7, window_bounds = array<i64: 1, 128>}, {pipeline_mode = #tpu.pipeline_mode<synchronous>, transform_indices = @transform_8, window_bounds = array<i64: 128, 128>}, {pipeline_mode = #tpu.pipeline_mode<synchronous>, transform_indices = @transform_9, window_bounds = array<i64: 1, 128>}, {pipeline_mode = #tpu.pipeline_mode<synchronous>, transform_indices = @transform_10, window_bounds = array<i64: 1, 128>}]} {
    %c0_i32 = arith.constant 0 : i32
    %0 = arith.cmpi eq, %arg0, %c0_i32 : i32
    %1 = arith.extui %0 : i1 to i32
    %c0_i32_0 = arith.constant 0 : i32
    %2 = arith.cmpi ne, %1, %c0_i32_0 : i32
    scf.if %2 {
      %cst_21 = arith.constant 0.000000e+00 : f32
      %67 = vector.broadcast %cst_21 : f32 to vector<16x128xf32>
      %c0_22 = arith.constant 0 : index
      %c0_23 = arith.constant 0 : index
      %68 = vector.load %arg12[%c0_22, %c0_23] : memref<16x128xf32, #tpu.memory_space<vmem>>, vector<16x128xf32>
      tpu.vector_store %arg12[%c0_22, %c0_23], %67 {strides = array<i32>} : memref<16x128xf32, #tpu.memory_space<vmem>>, vector<16x128xf32>,
      %c0_24 = arith.constant 0 : index
      %c0_25 = arith.constant 0 : index
      %69 = vector.load %arg3[%c0_24, %c0_25] : memref<16x128xf32, #tpu.memory_space<vmem>>, vector<16x128xf32>
      %70 = arith.truncf %69 : vector<16x128xf32> to vector<16x128xbf16>
      %c0_26 = arith.constant 0 : index
      %c0_27 = arith.constant 0 : index
      %71 = vector.load %arg13[%c0_26, %c0_27] : memref<16x128xbf16, #tpu.memory_space<vmem>>, vector<16x128xbf16>
      tpu.vector_store %arg13[%c0_26, %c0_27], %70 {strides = array<i32>} : memref<16x128xbf16, #tpu.memory_space<vmem>>, vector<16x128xbf16>,
    } else {
    }
    %c128_i32 = arith.constant 128 : i32
    %3 = arith.muli %arg0, %c128_i32 : i32
    %4 = tpu.assume_multiple %3, 128 : i32
    %5 = arith.index_cast %4 : i32 to index
    %c0 = arith.constant 0 : index
    %6 = vector.load %arg4[%5, %c0] : memref<384x4xf32, #tpu.memory_space<vmem>>, vector<128x4xf32>
    %c0_1 = arith.constant 0 : index
    %c0_2 = arith.constant 0 : index
    %7 = vector.load %arg5[%c0_1, %c0_2] : memref<4x128xf32, #tpu.memory_space<vmem>>, vector<4x128xf32>
    %c0_3 = arith.constant 0 : index
    %c0_4 = arith.constant 0 : index
    %8 = vector.load %arg6[%c0_3, %c0_4] : memref<1x128xf32, #tpu.memory_space<vmem>>, vector<1x128xf32>
    %9 = vector.extract_strided_slice %6 {offsets = [0, 0], sizes = [128, 1], strides = [1, 1]} : vector<128x4xf32> to vector<128x1xf32>
    %10 = vector.extract_strided_slice %7 {offsets = [0, 0], sizes = [1, 128], strides = [1, 1]} : vector<4x128xf32> to vector<1x128xf32>
    %11 = vector.broadcast %9 : vector<128x1xf32> to vector<128x128xf32>
    %12 = vector.broadcast %10 : vector<1x128xf32> to vector<128x128xf32>
    %13 = arith.mulf %11, %12 : vector<128x128xf32>
    %14 = vector.broadcast %8 : vector<1x128xf32> to vector<128x128xf32>
    %15 = arith.addf %14, %13 : vector<128x128xf32>
    %16 = vector.extract_strided_slice %6 {offsets = [0, 1], sizes = [128, 1], strides = [1, 1]} : vector<128x4xf32> to vector<128x1xf32>
    %17 = vector.extract_strided_slice %7 {offsets = [1, 0], sizes = [1, 128], strides = [1, 1]} : vector<4x128xf32> to vector<1x128xf32>
    %18 = vector.broadcast %16 : vector<128x1xf32> to vector<128x128xf32>
    %19 = vector.broadcast %17 : vector<1x128xf32> to vector<128x128xf32>
    %20 = arith.mulf %18, %19 : vector<128x128xf32>
    %21 = arith.addf %15, %20 : vector<128x128xf32>
    %22 = vector.extract_strided_slice %6 {offsets = [0, 2], sizes = [128, 1], strides = [1, 1]} : vector<128x4xf32> to vector<128x1xf32>
    %23 = vector.extract_strided_slice %7 {offsets = [2, 0], sizes = [1, 128], strides = [1, 1]} : vector<4x128xf32> to vector<1x128xf32>
    %24 = vector.broadcast %22 : vector<128x1xf32> to vector<128x128xf32>
    %25 = vector.broadcast %23 : vector<1x128xf32> to vector<128x128xf32>
    %26 = arith.mulf %24, %25 : vector<128x128xf32>
    %27 = arith.addf %21, %26 : vector<128x128xf32>
    %28 = vector.extract_strided_slice %6 {offsets = [0, 3], sizes = [128, 1], strides = [1, 1]} : vector<128x4xf32> to vector<128x1xf32>
    %29 = vector.extract_strided_slice %7 {offsets = [3, 0], sizes = [1, 128], strides = [1, 1]} : vector<4x128xf32> to vector<1x128xf32>
    %30 = vector.broadcast %28 : vector<128x1xf32> to vector<128x128xf32>
    %31 = vector.broadcast %29 : vector<1x128xf32> to vector<128x128xf32>
    %32 = arith.mulf %30, %31 : vector<128x128xf32>
    %33 = arith.addf %27, %32 : vector<128x128xf32>
    %cst = arith.constant 0.000000e+00 : f32
    %34 = vector.broadcast %cst : f32 to vector<128x128xf32>
    %35 = arith.maximumf %33, %34 : vector<128x128xf32>
    %36 = arith.index_cast %4 : i32 to index
    %c0_5 = arith.constant 0 : index
    %37 = vector.load %arg1[%36, %c0_5] : memref<384x1xi32, #tpu.memory_space<vmem>>, vector<128x1xi32>
    %c0_6 = arith.constant 0 : index
    %38 = arith.index_cast %4 : i32 to index
    %39 = vector.load %arg2[%c0_6, %38] : memref<1x384xi32, #tpu.memory_space<vmem>>, vector<1x128xi32>
    %40 = tpu.iota {dimensions = array<i32: 1>} : vector<128x16xi32>
    %41 = vector.broadcast %37 : vector<128x1xi32> to vector<128x16xi32>
    %42 = arith.cmpi eq, %40, %41 : vector<128x16xi32>
    %cst_7 = arith.constant 1.000000e+00 : f32
    %cst_8 = arith.constant 0.000000e+00 : f32
    %43 = vector.broadcast %cst_7 : f32 to vector<128x16xf32>
    %44 = vector.broadcast %cst_8 : f32 to vector<128x16xf32>
    %45 = arith.select %42, %43, %44 : vector<128x16xi1>, vector<128x16xf32>
    %46 = arith.truncf %45 : vector<128x16xf32> to vector<128x16xbf16>
    %c0_9 = arith.constant 0 : index
    %c0_10 = arith.constant 0 : index
    %47 = vector.load %arg13[%c0_9, %c0_10] : memref<16x128xbf16, #tpu.memory_space<vmem>>, vector<16x128xbf16>
    %cst_11 = arith.constant dense<0.000000e+00> : vector<128x128xf32>
    %48 = tpu.matmul %46, %47, %cst_11 {dimension_numbers = #tpu.dot_dimension_numbers<[1], [0], [0], [1], [0, 0, 1, 1], [], []>} : vector<128x16xbf16>, vector<16x128xbf16>, vector<128x128xf32> -> vector<128x128xf32>
    %49 = arith.addf %48, %35 : vector<128x128xf32>
    %cst_12 = arith.constant 0.000000e+00 : f32
    %50 = vector.broadcast %cst_12 : f32 to vector<128x128xf32>
    %51 = arith.maximumf %49, %50 : vector<128x128xf32>
    %52 = arith.truncf %51 : vector<128x128xf32> to vector<128x128xbf16>
    %53 = tpu.iota {dimensions = array<i32: 0>} : vector<16x128xi32>
    %54 = vector.broadcast %39 : vector<1x128xi32> to vector<16x128xi32>
    %55 = arith.cmpi eq, %53, %54 : vector<16x128xi32>
    %cst_13 = arith.constant 1.000000e+00 : f32
    %cst_14 = arith.constant 0.000000e+00 : f32
    %56 = vector.broadcast %cst_13 : f32 to vector<16x128xf32>
    %57 = vector.broadcast %cst_14 : f32 to vector<16x128xf32>
    %58 = arith.select %55, %56, %57 : vector<16x128xi1>, vector<16x128xf32>
    %59 = arith.truncf %58 : vector<16x128xf32> to vector<16x128xbf16>
    %c0_15 = arith.constant 0 : index
    %c0_16 = arith.constant 0 : index
    %60 = vector.load %arg12[%c0_15, %c0_16] : memref<16x128xf32, #tpu.memory_space<vmem>>, vector<16x128xf32>
    %cst_17 = arith.constant dense<0.000000e+00> : vector<16x128xf32>
    %61 = tpu.matmul %59, %52, %cst_17 {dimension_numbers = #tpu.dot_dimension_numbers<[1], [0], [0], [1], [0, 0, 1, 1], [], []>} : vector<16x128xbf16>, vector<128x128xbf16>, vector<16x128xf32> -> vector<16x128xf32>
    %62 = arith.addf %60, %61 : vector<16x128xf32>
    %c0_18 = arith.constant 0 : index
    %c0_19 = arith.constant 0 : index
    %63 = vector.load %arg12[%c0_18, %c0_19] : memref<16x128xf32, #tpu.memory_space<vmem>>, vector<16x128xf32>
    tpu.vector_store %arg12[%c0_18, %c0_19], %62 {strides = array<i32>} : memref<16x128xf32, #tpu.memory_space<vmem>>, vector<16x128xf32>,
    %c2_i32 = arith.constant 2 : i32
    %64 = arith.cmpi eq, %arg0, %c2_i32 : i32
    %65 = arith.extui %64 : i1 to i32
    %c0_i32_20 = arith.constant 0 : i32
    %66 = arith.cmpi ne, %65, %c0_i32_20 : i32
    scf.if %66 {
      %c0_21 = arith.constant 0 : index
      %c0_22 = arith.constant 0 : index
      %67 = vector.load %arg3[%c0_21, %c0_22] : memref<16x128xf32, #tpu.memory_space<vmem>>, vector<16x128xf32>
      %c0_23 = arith.constant 0 : index
      %c0_24 = arith.constant 0 : index
      %68 = vector.load %arg12[%c0_23, %c0_24] : memref<16x128xf32, #tpu.memory_space<vmem>>, vector<16x128xf32>
      %69 = arith.addf %67, %68 : vector<16x128xf32>
      %70 = arith.truncf %69 : vector<16x128xf32> to vector<16x128xbf16>
      %c0_25 = arith.constant 0 : index
      %c0_26 = arith.constant 0 : index
      %71 = vector.load %arg7[%c0_25, %c0_26] : memref<128x128xbf16, #tpu.memory_space<vmem>>, vector<128x128xbf16>
      %cst_27 = arith.constant dense<0.000000e+00> : vector<16x128xf32>
      %72 = tpu.matmul %70, %71, %cst_27 {dimension_numbers = #tpu.dot_dimension_numbers<[1], [0], [0], [1], [0, 0, 1, 1], [], []>} : vector<16x128xbf16>, vector<128x128xbf16>, vector<16x128xf32> -> vector<16x128xf32>
      %c0_28 = arith.constant 0 : index
      %c0_29 = arith.constant 0 : index
      %73 = vector.load %arg8[%c0_28, %c0_29] : memref<1x128xf32, #tpu.memory_space<vmem>>, vector<1x128xf32>
      %74 = vector.broadcast %73 : vector<1x128xf32> to vector<16x128xf32>
      %75 = arith.addf %72, %74 : vector<16x128xf32>
      %cst_30 = arith.constant 0.000000e+00 : f32
      %76 = vector.broadcast %cst_30 : f32 to vector<16x128xf32>
      %77 = arith.maximumf %75, %76 : vector<16x128xf32>
      %78 = tpu.iota {dimensions = array<i32: 0>} : vector<16x1xi32>
      %c16_i32 = arith.constant 16 : i32
      %79 = vector.broadcast %c16_i32 : i32 to vector<16x1xi32>
      %80 = arith.cmpi slt, %78, %79 : vector<16x1xi32>
      %cst_31 = arith.constant 0.000000e+00 : f32
      %81 = vector.shape_cast %80 : vector<16x1xi1> to vector<16x1xi1>
      %82 = vector.broadcast %81 : vector<16x1xi1> to vector<16x128xi1>
      %83 = vector.broadcast %cst_31 : f32 to vector<16x128xf32>
      %84 = arith.select %82, %77, %83 : vector<16x128xi1>, vector<16x128xf32>
      %cst_32 = arith.constant dense<0.000000e+00> : vector<128xf32>
      %85 = vector.multi_reduction <add>, %84, %cst_32 [0] : vector<16x128xf32> to vector<128xf32>
      %86 = vector.shape_cast %85 : vector<128xf32> to vector<1x128xf32>
      %cst_33 = arith.constant 6.250000e-02 : f32
      %87 = vector.broadcast %cst_33 : f32 to vector<1x128xf32>
      %88 = arith.mulf %86, %87 : vector<1x128xf32>
      %89 = arith.truncf %88 : vector<1x128xf32> to vector<1x128xbf16>
      %c0_34 = arith.constant 0 : index
      %c0_35 = arith.constant 0 : index
      %90 = vector.load %arg9[%c0_34, %c0_35] : memref<128x128xbf16, #tpu.memory_space<vmem>>, vector<128x128xbf16>
      %cst_36 = arith.constant dense<0.000000e+00> : vector<1x128xf32>
      %91 = tpu.matmul %89, %90, %cst_36 {dimension_numbers = #tpu.dot_dimension_numbers<[1], [0], [0], [1], [0, 0, 1, 1], [], []>} : vector<1x128xbf16>, vector<128x128xbf16>, vector<1x128xf32> -> vector<1x128xf32>
      %c0_37 = arith.constant 0 : index
      %c0_38 = arith.constant 0 : index
      %92 = vector.load %arg10[%c0_37, %c0_38] : memref<1x128xf32, #tpu.memory_space<vmem>>, vector<1x128xf32>
      %93 = arith.addf %91, %92 : vector<1x128xf32>
      %c0_39 = arith.constant 0 : index
      %c0_40 = arith.constant 0 : index
      %94 = vector.load %arg11[%c0_39, %c0_40] : memref<1x128xf32, #tpu.memory_space<vmem>>, vector<1x128xf32>
      tpu.vector_store %arg11[%c0_39, %c0_40], %93 {strides = array<i32>} : memref<1x128xf32, #tpu.memory_space<vmem>>, vector<1x128xf32>,
    } else {
    }
    return
  }
  func.func @transform_0(%arg0: i32) -> (i32, i32) {
    %c0_i32 = arith.constant 0 : i32
    %c0_i32_0 = arith.constant 0 : i32
    %c0_i32_1 = arith.constant 0 : i32
    return %c0_i32, %c0_i32_0 : i32, i32
  }
  func.func @transform_1(%arg0: i32) -> (i32, i32) {
    %c0_i32 = arith.constant 0 : i32
    %c0_i32_0 = arith.constant 0 : i32
    %c0_i32_1 = arith.constant 0 : i32
    return %c0_i32, %c0_i32_0 : i32, i32
  }
  func.func @transform_2(%arg0: i32) -> (i32, i32) {
    %c0_i32 = arith.constant 0 : i32
    %c0_i32_0 = arith.constant 0 : i32
    %c0_i32_1 = arith.constant 0 : i32
    return %c0_i32, %c0_i32_0 : i32, i32
  }
  func.func @transform_3(%arg0: i32) -> (i32, i32) {
    %c0_i32 = arith.constant 0 : i32
    %c0_i32_0 = arith.constant 0 : i32
    %c0_i32_1 = arith.constant 0 : i32
    return %c0_i32, %c0_i32_0 : i32, i32
  }
  func.func @transform_4(%arg0: i32) -> (i32, i32) {
    %c0_i32 = arith.constant 0 : i32
    %c0_i32_0 = arith.constant 0 : i32
    %c0_i32_1 = arith.constant 0 : i32
    return %c0_i32, %c0_i32_0 : i32, i32
  }
  func.func @transform_5(%arg0: i32) -> (i32, i32) {
    %c0_i32 = arith.constant 0 : i32
    %c0_i32_0 = arith.constant 0 : i32
    %c0_i32_1 = arith.constant 0 : i32
    return %c0_i32, %c0_i32_0 : i32, i32
  }
  func.func @transform_6(%arg0: i32) -> (i32, i32) {
    %c0_i32 = arith.constant 0 : i32
    %c0_i32_0 = arith.constant 0 : i32
    %c0_i32_1 = arith.constant 0 : i32
    return %c0_i32, %c0_i32_0 : i32, i32
  }
  func.func @transform_7(%arg0: i32) -> (i32, i32) {
    %c0_i32 = arith.constant 0 : i32
    %c0_i32_0 = arith.constant 0 : i32
    %c0_i32_1 = arith.constant 0 : i32
    return %c0_i32, %c0_i32_0 : i32, i32
  }
  func.func @transform_8(%arg0: i32) -> (i32, i32) {
    %c0_i32 = arith.constant 0 : i32
    %c0_i32_0 = arith.constant 0 : i32
    %c0_i32_1 = arith.constant 0 : i32
    return %c0_i32, %c0_i32_0 : i32, i32
  }
  func.func @transform_9(%arg0: i32) -> (i32, i32) {
    %c0_i32 = arith.constant 0 : i32
    %c0_i32_0 = arith.constant 0 : i32
    %c0_i32_1 = arith.constant 0 : i32
    return %c0_i32, %c0_i32_0 : i32, i32
  }
  func.func @transform_10(%arg0: i32) -> (i32, i32) {
    %c0_i32 = arith.constant 0 : i32
    %c0_i32_0 = arith.constant 0 : i32
    %c0_i32_1 = arith.constant 0 : i32
    return %c0_i32, %c0_i32_0 : i32, i32
  }
}

</mosaic_0001>

<bundles_post_ra>
// kernel: tpu_custom_call.1
= control target key start
LH: loop header
LB: loop body
LE: loop exit
PB: predicated region body
PF: predicated region fallthrough
CT: control target
= control target key end

     0   :  { %15 = vsyncpa [#allocation5], 0  ;;  %s1736_s13 = smov 0   ;;  %s2232_s0 = inlined_call_operand.vmem [shape: s32[384,1], index: 0, kind: input, shape index: {}]   ;;  %s2233_s1 = inlined_call_operand.vmem [shape: s32[1,384], index: 1, kind: input, shape index: {}]   ;;  %s2234_s2 = inlined_call_operand.vmem [shape: f32[16,128], index: 2, kind: input, shape index: {}]   ;;  %s2235_s3 = inlined_call_operand.vmem [shape: f32[384,4], index: 3, kind: input, shape index: {}]   ;;  %s2236_s4 = inlined_call_operand.vmem [shape: f32[4,128], index: 4, kind: input, shape index: {}]   ;;  %s2237_s5 = inlined_call_operand.vmem [shape: f32[1,128], index: 5, kind: input, shape index: {}]   ;;  %s2238_s6 = inlined_call_operand.vmem [shape: bf16[128,128], index: 6, kind: input, shape index: {}]   ;;  %s2239_s7 = inlined_call_operand.vmem [shape: f32[1,128], index: 7, kind: input, shape index: {}]   ;;  %s2240_s8 = inlined_call_operand.vmem [shape: bf16[128,128], index: 8, kind: input, shape index: {}]   ;;  %s2241_s9 = inlined_call_operand.vmem [shape: f32[1,128], index: 9, kind: input, shape index: {}]   ;;  %s2242_s10 = inlined_call_operand.hbm [shape: f32[1,128], index: 10, kind: output, shape index: {}]  }
   0x1 LB: > { %s1742_s14 = sadd.s32 4294967295, %s1668_s13   ;;  %p1401_p0 = scmp.ge.s32.totalorder %s1668_s13, 1  ;;  %s1668_s13 = sphi %s1736_s13, %s21_s13  }
   0x2   : > { %p298_p1 = scmp.lt.s32.totalorder %s1668_s13, 4 }
   0x4   : > { %p299_p2 = pnand %p1401_p0, %p298_p1 }
   0x5   : > { %p1402_p3 = scmp.ne.s32.totalorder (!%p299_p2), %s1742_s14, 0 }
   0x6   : > { %302 = sbr.rel (%p299_p2) target bundleno = 1116 (0x45c), region = 60 }
   0xd   : > { %330 = sbr.rel (%p1402_p3) target bundleno = 20 (0x14), region = 64  ;;  %v333_v0 = vld [vmem:[%s2234_s2] sm:$0xff] (!%p1402_p3)  ;;  %v334_v1 = vld [vmem:[%s2234_s2 + $0x8] sm:$0xff] (!%p1402_p3)  ;;  %v1670_v2 = vmov (!%p1402_p3), 0.0  }
   0xe   : > { %331 = vst [vmem:[#allocation2] sm:$0xff] (!%p1402_p3), %v1670_v2  ;;  %332 = vst [vmem:[#allocation2 + $0x8] sm:$0xff] (!%p1402_p3), %v1670_v2  ;;  %v335_v3 = vpack.c.bf16 (!%p1402_p3), %v334_v1, %v333_v0 }
  0x10   : > { %336 = vst [vmem:[#allocation3] sm:$0xff] (!%p1402_p3), %v335_v3 }
  0x14 PF: > { %s1754_s19 = sshll.u32 %s1742_s14, 7  ;;  %v1671_v4 = vmov 0   ;;  %v1672_v7 = vmov 0.0   ;;  %v1673_v24 = vmov 3   ;;  %v1674_v26 = vmov 1   ;;  %p1416_p4 = scmp.ne.s32.totalorder %s1742_s14, 2 }
  0x15   : > { %1578 = vset.pattern.permute.xlu1 %v1671_v4  ;;  %1577 = vset.pattern.permute.xlu0 %v1671_v4  ;;  %s1762_s22 = scalar_lea.vmem %s2232_s0, %s1754_s19  ;;  %s1785_s25 = scalar_lea.vmem %s2235_s3, %s1754_s19  ;;  %v1675_v30 = vmov 2   ;;  %v437_v42 = vlaneseq  ;;  %vm907_vm4 = vcmask 130048  }
  0x16   : > { %v798_v5 = vld [vmem:[%s1762_s22 + $0x10] sm:$0xff]  ;;  %v796_v6 = vld [vmem:[%s1762_s22] sm:$0xff]  ;;  %1492 = vmatprep.subr.bf16.mxu1 %v1672_v7  ;;  %v799_v8 = vld [vmem:[%s1762_s22 + $0x18] sm:$0xff]  ;;  %s812_s30 = sshra.s32 %s1754_s19, 7 }
  0x17   : > { %825 = vperm.xlu1 %1578, %v798_v5   ;;  %819 = vperm.xlu0 %1577, %v796_v6   ;;  %v797_v9 = vld [vmem:[%s1762_s22 + $0x8] sm:$0xff]  ;;  %v800_v11 = vld [vmem:[%s1762_s22 + $0x20] sm:$0xff]  ;;  %v906_v12 = vld [vmem:[#allocation3] sm:$0xff]  ;;  %v1862_v43 = vand.u32 127, %v437_v42  ;;  %s814_s15 = scalar_lea.vmem %s2233_s1, %s812_s30 }
  0x18   : > { %v801_v10 = vld [vmem:[%s1762_s22 + $0x28] sm:$0xff]  ;;  %v803_v13 = vld [vmem:[%s1762_s22 + $0x38] sm:$0xff]  ;;  %v802_v14 = vld [vmem:[%s1762_s22 + $0x30] sm:$0xff]  ;;  %1474 = vmatprep.subr.bf16.mxu0 %v906_v12 }
  0x19   : > { %1475 = vmatpush3.bf16.msra.mxu0 %v906_v12  ;;  %v805_v15 = vld [vmem:[%s1762_s22 + $0x48] sm:$0xff]  ;;  %v804_v16 = vld [vmem:[%s1762_s22 + $0x40] sm:$0xff]  ;;  %v807_v17 = vld [vmem:[%s1762_s22 + $0x58] sm:$0xff] }
  0x1a   : > { %v806_v18 = vld [vmem:[%s1762_s22 + $0x50] sm:$0xff]  ;;  %v809_v19 = vld [vmem:[%s1762_s22 + $0x68] sm:$0xff]  ;;  %v808_v20 = vld [vmem:[%s1762_s22 + $0x60] sm:$0xff] }
  0x1b   : > { %828 = vperm.xlu1 %1578, %v799_v8   ;;  %822 = vperm.xlu0 %1577, %v797_v9   ;;  %v811_v21 = vld [vmem:[%s1762_s22 + $0x78] sm:$0xff]  ;;  %v810_v22 = vld [vmem:[%s1762_s22 + $0x70] sm:$0xff]  ;;  %v340_v23 = vld [vmem:[%s1785_s25 + $0x8] sm:$0xff]  ;;  %v1896_v9 = vshrl.u32 %v437_v42, 7 }
  0x1c   : > { %v343_v25 = vld [vmem:[%s1785_s25 + $0x20] sm:$0xff]  ;;  %v1792_v27 = vld [vmem:[%s1785_s25 + $0x38] sm:$0xff]  ;;  %v341_v28 = vld [vmem:[%s1785_s25 + $0x10] sm:$0xff] }
  0x1d   : > { %v339_v29 = vld [vmem:[%s1785_s25] sm:$0xff]  ;;  %v344_v31 = vld [vmem:[%s1785_s25 + $0x28] sm:$0xff]  ;;  %v342_v33 = vld [vmem:[%s1785_s25 + $0x18] sm:$0xff] }
  0x1e   : > { %v1802_v32 = vld [vmem:[%s1785_s25 + $0x40] sm:$0xff]  ;;  %v1808_v34 = vld [vmem:[%s1785_s25 + $0x58] sm:$0xff]  ;;  %v1815_v35 = vld [vmem:[%s1785_s25 + $0x30] sm:$0xff] }
  0x1f   : > { %834 = vperm.xlu1 %1578, %v801_v10   ;;  %831 = vperm.xlu0 %1577, %v800_v11   ;;  %v1819_v36 = vld [vmem:[%s1785_s25 + $0x48] sm:$0xff]  ;;  %v1824_v37 = vld [vmem:[%s1785_s25 + $0x60] sm:$0xff]  ;;  %v1829_v38 = vld [vmem:[%s1785_s25 + $0x78] sm:$0xff] }
  0x20   : > { %v1842_v39 = vld [vmem:[%s1785_s25 + $0x70] sm:$0xff]  ;;  %v1853_v41 = vld [vmem:[%s1785_s25 + $0x68] sm:$0xff]  ;;  %v1933_v42 = vld [vmem:[%s2237_s5] ss:$0 sm:$0xff] }
  0x21   : > { %v1848_v40 = vld [vmem:[%s1785_s25 + $0x50] sm:$0xff] }
  0x23   : > { %840 = vperm.xlu1 %1578, %v803_v13   ;;  %837 = vperm.xlu0 %1577, %v802_v14  }
  0x27   : > { %846 = vperm.xlu1 %1578, %v805_v15   ;;  %843 = vperm.xlu0 %1577, %v804_v16   ;;  %v439_v15 = vsub.s32 0, %v1896_v9 }
  0x2b   : > { %852 = vperm.xlu1 %1578, %v807_v17   ;;  %849 = vperm.xlu0 %1577, %v806_v18   ;;  %v355_v18 = vld [vmem:[%s2236_s4] sm:$0xf] }
  0x2f   : > { %858 = vperm.xlu1 %1578, %v809_v19   ;;  %855 = vperm.xlu0 %1577, %v808_v20  }
  0x33   : > { %864 = vperm.xlu1 %1578, %v811_v21   ;;  %861 = vperm.xlu0 %1577, %v810_v22   ;;  %v1919_v22 = vrot.slane %v355_v18, %v439_v15 }
  0x37   : > { %1584 = vset.pattern.permute.xlu0 %v1673_v24  ;;  %364 = vperm.xlu1 %1578, %v340_v23  }
  0x38   : > { %684 = vperm.xlu0 %1584, %v340_v23  }
  0x3b   : > { %1579 = vset.pattern.permute.xlu1 %v1674_v26 }
  0x3c   : > { %696 = vperm.xlu0 %1584, %v343_v25   ;;  %484 = vperm.xlu1 %1579, %v340_v23  }
  0x40   : > { %708 = vperm.xlu0 %1584, %v1792_v27   ;;  %1580 = vset.pattern.permute.xlu1 %v1671_v4 }
  0x41   : > { %369 = vperm.xlu1 %1580, %v341_v28  }
  0x44   : > { %1597 = vset.pattern.permute.xlu0 %v1675_v30 }
  0x45   : > { %588 = vperm.xlu0 %1597, %v341_v28   ;;  %1581 = vset.pattern.permute.xlu1 %v1675_v30 }
  0x46   : > { %580 = vperm.xlu1 %1581, %v339_v29  }
  0x49   : > { %600 = vperm.xlu0 %1597, %v344_v31  }
  0x4a   : > { %584 = vperm.xlu1 %1581, %v340_v23  }
  0x4d   : > { %612 = vperm.xlu0 %1597, %v1802_v32  }
  0x4e   : > { %1582 = vset.pattern.permute.xlu1 %v1674_v26 }
  0x4f   : > { %492 = vperm.xlu1 %1582, %v342_v33  }
  0x51   : > { %624 = vperm.xlu0 %1597, %v1808_v34  }
  0x53   : > { %1583 = vset.pattern.permute.xlu1 %v1673_v24 }
  0x54   : > { %680 = vperm.xlu1 %1583, %v339_v29  }
  0x55   : > { %1604 = vset.pattern.permute.xlu0 %v1671_v4 }
  0x56   : > { %359 = vperm.xlu0 %1604, %v339_v29  }
  0x58   : > { %1585 = vset.pattern.permute.xlu1 %v1671_v4 }
  0x59   : > { %379 = vperm.xlu1 %1585, %v343_v25  }
  0x5a   : > { %374 = vperm.xlu0 %1604, %v342_v33  }
  0x5d   : > { %384 = vperm.xlu1 %1585, %v344_v31  }
  0x5e   : > { %389 = vperm.xlu0 %1604, %v1815_v35  }
  0x61   : > { %1586 = vset.pattern.permute.xlu1 %v1675_v30 }
  0x62   : > { %404 = vperm.xlu0 %1604, %v1819_v36   ;;  %592 = vperm.xlu1 %1586, %v342_v33  }
  0x66   : > { %419 = vperm.xlu0 %1604, %v1824_v37   ;;  %1587 = vset.pattern.permute.xlu1 %v1674_v26 }
  0x67   : > { %496 = vperm.xlu1 %1587, %v343_v25  }
  0x6a   : > { %434 = vperm.xlu0 %1604, %v1829_v38  }
  0x6b   : > { %1588 = vset.pattern.permute.xlu1 %v1673_v24 }
  0x6c   : > { %688 = vperm.xlu1 %1588, %v341_v28  }
  0x6e   : > { %1608 = vset.pattern.permute.xlu0 %v1674_v26 }
  0x6f   : > { %480 = vperm.xlu0 %1608, %v339_v29  }
  0x70   : > { %692 = vperm.xlu1 %1588, %v342_v33  }
  0x73   : > { %488 = vperm.xlu0 %1608, %v341_v28  }
  0x74   : > { %1589 = vset.pattern.permute.xlu1 %v1671_v4 }
  0x75   : > { %394 = vperm.xlu1 %1589, %v1792_v27  }
  0x77   : > { %500 = vperm.xlu0 %1608, %v344_v31  }
  0x79   : > { %1590 = vset.pattern.permute.xlu1 %v1675_v30 }
  0x7a   : > { %596 = vperm.xlu1 %1590, %v343_v25  }
  0x7b   : > { %512 = vperm.xlu0 %1608, %v1802_v32  }
  0x7e   : > { %1591 = vset.pattern.permute.xlu1 %v1674_v26 }
  0x7f   : > { %504 = vperm.xlu1 %1591, %v1815_v35   ;;  %524 = vperm.xlu0 %1608, %v1808_v34  }
  0x83   : > { %508 = vperm.xlu1 %1591, %v1792_v27   ;;  %536 = vperm.xlu0 %1608, %v1842_v39  }
  0x87   : > { %1592 = vset.pattern.permute.xlu1 %v1673_v24  ;;  %1610 = vset.pattern.permute.xlu0 %v1673_v24 }
  0x88   : > { %700 = vperm.xlu1 %1592, %v344_v31   ;;  %720 = vperm.xlu0 %1610, %v1848_v40  }
  0x8c   : > { %1593 = vset.pattern.permute.xlu1 %v1671_v4  ;;  %732 = vperm.xlu0 %1610, %v1853_v41  }
  0x8d   : > { %399 = vperm.xlu1 %1593, %v1802_v32  }
  0x90   : > { %736 = vperm.xlu0 %1610, %v1842_v39  }
  0x91   : > { %1594 = vset.pattern.permute.xlu1 %v1675_v30 }
  0x92   : > { %604 = vperm.xlu1 %1594, %v1815_v35  }
  0x94   : > { %1615 = vset.pattern.permute.xlu0 %v1671_v4 }
  0x96   : > { %v826_v44 = vpop.permute.xlu1 %825  ;;  %v820_v45 = vpop.permute.xlu0 %819  ;;  %608 = vperm.xlu1 %1594, %v1792_v27   ;;  %v545_v27 = vsub.s32 1, %v1896_v9 }
  0x97   : > { %vm868_vm0 = vcmp.eq.s32.totalorder %v1862_v43, %v826_v44  ;;  %vm866_vm1 = vcmp.eq.s32.totalorder %v1862_v43, %v820_v45 }
  0x98   : > { %v884_v48 = vsel %vm868_vm0, 1.0, %v1672_v7  ;;  %v882_v49 = vsel %vm866_vm1, 1.0, %v1672_v7  ;;  %vm1676_vm1 = vmmov 0  }
  0x99   : > { %1508 = vmatprep.mubr.msk.bf16.mxu1 %vm1676_vm1, %v1672_v7 }
  0x9a   : > { %v829_v46 = vpop.permute.xlu1 %828  ;;  %v823_v47 = vpop.permute.xlu0 %822  ;;  %1595 = vset.pattern.permute.xlu1 %v1674_v26 }
  0x9b   : > { %vm869_vm2 = vcmp.eq.s32.totalorder %v1862_v43, %v829_v46  ;;  %vm867_vm3 = vcmp.eq.s32.totalorder %v1862_v43, %v823_v47  ;;  %516 = vperm.xlu1 %1595, %v1819_v36  }
  0x9c   : > { %v885_v50 = vsel %vm869_vm2, 1.0, %v1672_v7  ;;  %v883_v51 = vsel %vm867_vm3, 1.0, %v1672_v7 }
  0x9d   : > { %v899_v52 = vpack.c.bf16 %v885_v50, %v884_v48  ;;  %v898_v53 = vpack.c.bf16 %v883_v51, %v882_v49  ;;  %v645_v49 = vsub.s32 2, %v1896_v9  ;;  %v745_v51 = vsub.s32 3, %v1896_v9 }
  0x9e   : > { %v835_v54 = vpop.permute.xlu1 %834  ;;  %v832_v55 = vpop.permute.xlu0 %831 }
  0x9f   : > { %vm871_vm5 = vcmp.eq.s32.totalorder %v1862_v43, %v835_v54  ;;  %vm870_vm6 = vcmp.eq.s32.totalorder %v1862_v43, %v832_v55  ;;  %1476 = vmatprep.mubr.msk.bf16.mxu0 %vm907_vm4, %v898_v53  ;;  %1596 = vset.pattern.permute.xlu1 %v1673_v24  ;;  %v1954_v54 = vrot.slane %v355_v18, %v745_v51 }
  0xa0   : > { %v887_v56 = vsel %vm871_vm5, 1.0, %v1672_v7  ;;  %v886_v57 = vsel %vm870_vm6, 1.0, %v1672_v7  ;;  %1477 = vmatmul.mubr.msk.bf16.vlgmr.msra.gmra.mrb[0].mxu0 %vm907_vm4, %v899_v52  ;;  %704 = vperm.xlu1 %1596, %v1815_v35   ;;  %v1928_v35 = vrot.slane %v355_v18, %v545_v27  ;;  %v1949_v52 = vrot.slane %v355_v18, %v645_v49 }
  0xa1   : > { %v900_v58 = vpack.c.bf16 %v887_v56, %v886_v57  ;;  %vm1679_vm5 = vmmov (!%p1416_p4), 0  }
  0xa2   : > { %v841_v59 = vpop.permute.xlu1 %840  ;;  %v838_v60 = vpop.permute.xlu0 %837 }
  0xa3   : > { %vm873_vm7 = vcmp.eq.s32.totalorder %v1862_v43, %v841_v59  ;;  %vm872_vm8 = vcmp.eq.s32.totalorder %v1862_v43, %v838_v60  ;;  %1480 = vmatprep.mubr.msk.bf16.mxu0 %vm907_vm4, %v900_v58 }
  0xa4   : > { %v889_v61 = vsel %vm873_vm7, 1.0, %v1672_v7  ;;  %v888_v62 = vsel %vm872_vm8, 1.0, %v1672_v7  ;;  %1598 = vset.pattern.permute.xlu1 %v1671_v4 }
  0xa5   : > { %v901_v63 = vpack.c.bf16 %v889_v61, %v888_v62  ;;  %409 = vperm.xlu1 %1598, %v1848_v40  }
  0xa6   : > { %v847_v0 = vpop.permute.xlu1 %846  ;;  %v844_v1 = vpop.permute.xlu0 %843 }
  0xa7   : > { %vm875_vm9 = vcmp.eq.s32.totalorder %v1862_v43, %v847_v0  ;;  %vm874_vm10 = vcmp.eq.s32.totalorder %v1862_v43, %v844_v1 }
  0xa8   : > { %v891_v2 = vsel %vm875_vm9, 1.0, %v1672_v7  ;;  %v890_v3 = vsel %vm874_vm10, 1.0, %v1672_v7  ;;  %1481 = vmatmul.mubr.msk.bf16.gmra.mrb[4].mxu0 %vm907_vm4, %v901_v63 }
  0xa9   : > { %v902_v5 = vpack.c.bf16 %v891_v2, %v890_v3  ;;  %414 = vperm.xlu1 %1598, %v1808_v34  }
  0xaa   : > { %v853_v6 = vpop.permute.xlu1 %852  ;;  %v850_v8 = vpop.permute.xlu0 %849 }
  0xab   : > { %vm877_vm11 = vcmp.eq.s32.totalorder %v1862_v43, %v853_v6  ;;  %vm876_vm12 = vcmp.eq.s32.totalorder %v1862_v43, %v850_v8  ;;  %1484 = vmatprep.mubr.msk.bf16.mxu0 %vm907_vm4, %v902_v5 }
  0xac   : > { %v893_v10 = vsel %vm877_vm11, 1.0, %v1672_v7  ;;  %v892_v11 = vsel %vm876_vm12, 1.0, %v1672_v7 }
  0xad   : > { %v903_v12 = vpack.c.bf16 %v893_v10, %v892_v11  ;;  %1599 = vset.pattern.permute.xlu1 %v1675_v30 }
  0xae   : > { %v859_v13 = vpop.permute.xlu1 %858  ;;  %v856_v14 = vpop.permute.xlu0 %855  ;;  %616 = vperm.xlu1 %1599, %v1819_v36  }
  0xaf   : > { %vm879_vm13 = vcmp.eq.s32.totalorder %v1862_v43, %v859_v13  ;;  %vm878_vm14 = vcmp.eq.s32.totalorder %v1862_v43, %v856_v14 }
  0xb0   : > { %v895_v16 = vsel %vm879_vm13, 1.0, %v1672_v7  ;;  %v894_v17 = vsel %vm878_vm14, 1.0, %v1672_v7  ;;  %1485 = vmatmul.mubr.msk.bf16.gmra.mrb[8].mxu0 %vm907_vm4, %v903_v12 }
  0xb1   : > { %v904_v19 = vpack.c.bf16 %v895_v16, %v894_v17 }
  0xb2   : > { %v865_v20 = vpop.permute.xlu1 %864  ;;  %v862_v21 = vpop.permute.xlu0 %861  ;;  %1600 = vset.pattern.permute.xlu1 %v1674_v26 }
  0xb3   : > { %vm881_vm15 = vcmp.eq.s32.totalorder %v1862_v43, %v865_v20  ;;  %vm880_vm0 = vcmp.eq.s32.totalorder %v1862_v43, %v862_v21  ;;  %1488 = vmatprep.mubr.msk.bf16.mxu0 %vm907_vm4, %v904_v19  ;;  %520 = vperm.xlu1 %1600, %v1848_v40  }
  0xb4   : > { %v897_v23 = vsel %vm881_vm15, 1.0, %v1672_v7  ;;  %v896_v25 = vsel %vm880_vm0, 1.0, %v1672_v7 }
  0xb5   : > { %v905_v28 = vpack.c.bf16 %v897_v23, %v896_v25 }
  0xb6   : > { %v365_v29 = vpop.permute.xlu1 %364 }
  0xb7   : > { %v442_v31 = vmul.f32 %v1919_v22, %v365_v29  ;;  %1601 = vset.pattern.permute.xlu1 %v1673_v24  ;;  %v685_v33 = vpop.permute.xlu0 %684 }
  0xb8   : > { %1489 = vmatmul.mubr.msk.bf16.gmra.mrb[12].mxu0 %vm907_vm4, %v905_v28  ;;  %712 = vperm.xlu1 %1601, %v1802_v32   ;;  %v748_v58 = vmul.f32 %v1954_v54, %v685_v33 }
  0xb9   : > { %v464_v45 = vadd.f32 %v1933_v42, %v442_v31 }
  0xbb   : > { %v485_v43 = vpop.permute.xlu1 %484  ;;  %v1935_v44 = vpop.permute.xlu0 %696 }
  0xbc   : > { %v548_v46 = vmul.f32 %v1928_v35, %v485_v43  ;;  %716 = vperm.xlu1 %1601, %v1819_v36  }
  0xbe   : > { %v564_v47 = vadd.f32 %v548_v46, %v464_v45 }
  0xbf   : > { %v1940_v48 = vpop.permute.xlu0 %708 }
  0xc0   : > { %1602 = vset.pattern.permute.xlu1 %v1671_v4  ;;  %v370_v32 = vpop.permute.xlu1 %369 }
  0xc1   : > { %v1945_v50 = vmul.f32 %v1919_v22, %v370_v32  ;;  %424 = vperm.xlu1 %1602, %v1853_v41  }
  0xc3   : > { %v465_v32 = vadd.f32 %v1933_v42, %v1945_v50 }
  0xc4   : > { %v1951_v53 = vpop.permute.xlu0 %588 }
  0xc5   : > { %1603 = vset.pattern.permute.xlu1 %v1675_v30  ;;  %v581_v36 = vpop.permute.xlu1 %580 }
  0xc6   : > { %v1957_v55 = vmul.f32 %v1949_v52, %v581_v36  ;;  %620 = vperm.xlu1 %1603, %v1848_v40  }
  0xc8   : > { %v1960_v56 = vpop.permute.xlu0 %600 }
  0xc9   : > { %v585_v57 = vpop.permute.xlu1 %584 }
  0xca   : > { %v648_v59 = vmul.f32 %v1949_v52, %v585_v57  ;;  %1605 = vset.pattern.permute.xlu1 %v1674_v26 }
  0xcb   : > { %528 = vperm.xlu1 %1605, %v1824_v37  }
  0xcc   : > { %v664_v60 = vadd.f32 %v648_v59, %v564_v47  ;;  %v1966_v61 = vpop.permute.xlu0 %612  ;;  %v652_v59 = vmul.f32 %v1949_v52, %v1960_v56 }
  0xce   : > { %v493_v62 = vpop.permute.xlu1 %492  ;;  %v1968_v63 = vadd.f32 %v748_v58, %v664_v60 }
  0xcf   : > { %532 = vperm.xlu1 %1605, %v1853_v41   ;;  %v550_v40 = vmul.f32 %v1928_v35, %v493_v62 }
  0xd0   : > { %v1972_v0 = vpop.permute.xlu0 %624 }
  0xd3   : > { %1606 = vset.pattern.permute.xlu1 %v1673_v24  ;;  %v681_v1 = vpop.permute.xlu1 %680 }
  0xd4   : > { %724 = vperm.xlu1 %1606, %v1808_v34   ;;  %v747_v2 = vmul.f32 %v1954_v54, %v681_v1 }
  0xd5   : > { %v360_v3 = vpop.permute.xlu0 %359 }
  0xd6   : > { %v441_v23 = vmul.f32 %v1919_v22, %v360_v3 }
  0xd8   : > { %1607 = vset.pattern.permute.xlu1 %v1671_v4  ;;  %v380_v5 = vpop.permute.xlu1 %379  ;;  %v463_v29 = vadd.f32 %v1933_v42, %v441_v23 }
  0xd9   : > { %429 = vperm.xlu1 %1607, %v1842_v39   ;;  %v375_v6 = vpop.permute.xlu0 %374  ;;  %v445_v8 = vmul.f32 %v1919_v22, %v380_v5 }
  0xda   : > { %v444_v10 = vmul.f32 %v1919_v22, %v375_v6 }
  0xdb   : > { %v467_v18 = vadd.f32 %v1933_v42, %v445_v8 }
  0xdc   : > { %v466_v11 = vadd.f32 %v1933_v42, %v444_v10  ;;  %v385_v12 = vpop.permute.xlu1 %384 }
  0xdd   : > { %1609 = vset.pattern.permute.xlu1 %v1675_v30  ;;  %v390_v13 = vpop.permute.xlu0 %389  ;;  %v446_v34 = vmul.f32 %v1919_v22, %v385_v12 }
  0xde   : > { %628 = vperm.xlu1 %1609, %v1824_v37   ;;  %v566_v14 = vadd.f32 %v550_v40, %v466_v11 }
  0xdf   : > { %v468_v50 = vadd.f32 %v1933_v42, %v446_v34 }
  0xe1   : > { %v1985_v4 = vpop.permute.xlu0 %404  ;;  %v593_v15 = vpop.permute.xlu1 %592 }
  0xe2   : > { %632 = vperm.xlu1 %1609, %v1853_v41   ;;  %v650_v16 = vmul.f32 %v1949_v52, %v593_v15 }
  0xe4   : > { %v666_v17 = vadd.f32 %v650_v16, %v566_v14 }
  0xe5   : > { %v1990_v19 = vpop.permute.xlu0 %419 }
  0xe6   : > { %1611 = vset.pattern.permute.xlu1 %v1674_v26  ;;  %v497_v20 = vpop.permute.xlu1 %496 }
  0xe7   : > { %540 = vperm.xlu1 %1611, %v1829_v38   ;;  %v551_v21 = vmul.f32 %v1928_v35, %v497_v20 }
  0xe9   : > { %v567_v25 = vadd.f32 %v551_v21, %v467_v18  ;;  %v1996_v27 = vpop.permute.xlu0 %434  ;;  %v655_v21 = vmul.f32 %v1949_v52, %v1966_v61 }
  0xeb   : > { %1612 = vset.pattern.permute.xlu1 %v1673_v24  ;;  %v689_v41 = vpop.permute.xlu1 %688 }
  0xec   : > { %v749_v28 = vmul.f32 %v1954_v54, %v689_v41  ;;  %728 = vperm.xlu1 %1612, %v1824_v37   ;;  %v649_v37 = vmul.f32 %v1949_v52, %v1951_v53 }
  0xee   : > { %v481_v26 = vpop.permute.xlu0 %480 }
  0xef   : > { %v547_v31 = vmul.f32 %v1928_v35, %v481_v26  ;;  %v693_v33 = vpop.permute.xlu1 %692 }
  0xf0   : > { %v750_v43 = vmul.f32 %v1954_v54, %v693_v33  ;;  %1613 = vset.pattern.permute.xlu1 %v1675_v30 }
  0xf1   : > { %v563_v45 = vadd.f32 %v547_v31, %v463_v29  ;;  %636 = vperm.xlu1 %1613, %v1842_v39   ;;  %v450_v31 = vmul.f32 %v1919_v22, %v1985_v4 }
  0xf2   : > { %v2006_v46 = vadd.f32 %v750_v43, %v666_v17  ;;  %v489_v47 = vpop.permute.xlu0 %488  ;;  %v754_v43 = vmul.f32 %v1954_v54, %v1940_v48 }
  0xf3   : > { %v663_v49 = vadd.f32 %v1957_v55, %v563_v45  ;;  %v549_v51 = vmul.f32 %v1928_v35, %v489_v47  ;;  %v447_v55 = vmul.f32 %v1919_v22, %v390_v13  ;;  %v472_v61 = vadd.f32 %v1933_v42, %v450_v31 }
  0xf4   : > { %v395_v36 = vpop.permute.xlu1 %394 }
  0xf5   : > { %v565_v57 = vadd.f32 %v549_v51, %v465_v32  ;;  %640 = vperm.xlu1 %1613, %v1829_v38   ;;  %v448_v30 = vmul.f32 %v1919_v22, %v395_v36  ;;  %v2016_v39 = vadd.f32 %v747_v2, %v663_v49  ;;  %v751_v2 = vmul.f32 %v1954_v54, %v1935_v44 }
  0xf6   : > { %v501_v58 = vpop.permute.xlu0 %500  ;;  %v469_v6 = vadd.f32 %v1933_v42, %v447_v55 }
  0xf7   : > { %v665_v60 = vadd.f32 %v649_v37, %v565_v57  ;;  %v552_v53 = vmul.f32 %v1928_v35, %v501_v58 }
  0xf9   : > { %v568_v62 = vadd.f32 %v552_v53, %v468_v50  ;;  %1614 = vset.pattern.permute.xlu1 %v1673_v24  ;;  %v597_v40 = vpop.permute.xlu1 %596  ;;  %v2024_v1 = vadd.f32 %v749_v28, %v665_v60  ;;  %v470_v24 = vadd.f32 %v1933_v42, %v448_v30 }
  0xfa   : > { %v651_v3 = vmul.f32 %v1949_v52, %v597_v40  ;;  %740 = vperm.xlu1 %1614, %v1829_v38   ;;  %v513_v16 = vpop.permute.xlu0 %512 }
  0xfb   : > { %v668_v56 = vadd.f32 %v652_v59, %v568_v62  ;;  %v555_v20 = vmul.f32 %v1928_v35, %v513_v16 }
  0xfc   : > { %v667_v5 = vadd.f32 %v651_v3, %v567_v25 }
  0xfe   : > { %v505_v8 = vpop.permute.xlu1 %504  ;;  %v2031_v10 = vadd.f32 %v751_v2, %v667_v5 }
  0xff   : > { %v553_v11 = vmul.f32 %v1928_v35, %v505_v8 }
 0x101   : > { %v569_v12 = vadd.f32 %v553_v11, %v469_v6 }
 0x102   : > { %v509_v13 = vpop.permute.xlu1 %508 }
 0x103   : > { %v554_v34 = vmul.f32 %v1928_v35, %v509_v13 }
 0x105   : > { %v570_v44 = vadd.f32 %v554_v34, %v470_v24  ;;  %v525_v34 = vpop.permute.xlu0 %524 }
 0x107   : > { %v701_v14 = vpop.permute.xlu1 %700 }
 0x108   : > { %v752_v15 = vmul.f32 %v1954_v54, %v701_v14 }
 0x109   : > { %v537_v14 = vpop.permute.xlu0 %536 }
 0x10a   : > { %v2037_v38 = vadd.f32 %v752_v15, %v668_v56 }
 0x10c   : > { %v400_v17 = vpop.permute.xlu1 %399 }
 0x10d   : > { %v449_v18 = vmul.f32 %v1919_v22, %v400_v17 }
 0x10f   : > { %v471_v23 = vadd.f32 %v1933_v42, %v449_v18  ;;  %v721_v18 = vpop.permute.xlu0 %720 }
 0x111   : > { %v605_v25 = vpop.permute.xlu1 %604  ;;  %v571_v41 = vadd.f32 %v555_v20, %v471_v23  ;;  %v781_v20 = vmax.f32 %v2024_v1, 0.0  ;;  %v456_v23 = vmul.f32 %v1919_v22, %v1996_v27  ;;  %v558_v1 = vmul.f32 %v1928_v35, %v525_v34 }
 0x112   : > { %v653_v28 = vmul.f32 %v1949_v52, %v605_v25  ;;  %v780_v27 = vmax.f32 %v1968_v63, 0.0 }
 0x113   : > { %v671_v29 = vadd.f32 %v655_v21, %v571_v41  ;;  %v453_v21 = vmul.f32 %v1919_v22, %v1990_v19  ;;  %v779_v41 = vmax.f32 %v2016_v39, 0.0  ;;  %v658_v39 = vmul.f32 %v1949_v52, %v1972_v0 }
 0x114   : > { %v669_v26 = vadd.f32 %v653_v28, %v569_v12  ;;  %v757_v0 = vmul.f32 %v1954_v54, %v721_v18 }
 0x115   : > { %v609_v33 = vpop.permute.xlu1 %608 }
 0x116   : > { %v654_v45 = vmul.f32 %v1949_v52, %v609_v33  ;;  %v782_v33 = vmax.f32 %v2006_v46, 0.0  ;;  %v2096_v46 = vadd.f32 %v1933_v42, %v456_v23 }
 0x118   : > { %v670_v47 = vadd.f32 %v654_v45, %v570_v44 }
 0x11a   : > { %v517_v32 = vpop.permute.xlu1 %516  ;;  %v2051_v37 = vadd.f32 %v754_v43, %v670_v47 }
 0x11b   : > { %v556_v49 = vmul.f32 %v1928_v35, %v517_v32  ;;  %v733_v32 = vpop.permute.xlu0 %732 }
 0x11d   : > { %v572_v51 = vadd.f32 %v556_v49, %v472_v61 }
 0x11f   : > { %v705_v36 = vpop.permute.xlu1 %704 }
 0x120   : > { %v753_v4 = vmul.f32 %v1954_v54, %v705_v36  ;;  %v475_v36 = vadd.f32 %v1933_v42, %v453_v21 }
 0x122   : > { %v2056_v57 = vadd.f32 %v753_v4, %v669_v26 }
 0x124   : > { %v410_v48 = vpop.permute.xlu1 %409  ;;  %v785_v34 = vmax.f32 %v2056_v57, 0.0 }
 0x125   : > { %v451_v16 = vmul.f32 %v1919_v22, %v410_v48  ;;  %v783_v48 = vmax.f32 %v2031_v10, 0.0 }
 0x127   : > { %v473_v28 = vadd.f32 %v1933_v42, %v451_v16  ;;  %v561_v16 = vmul.f32 %v1928_v35, %v537_v14 }
 0x128   : > { %v415_v30 = vpop.permute.xlu1 %414 }
 0x129   : > { %v452_v17 = vmul.f32 %v1919_v22, %v415_v30 }
 0x12b   : > { %v474_v43 = vadd.f32 %v1933_v42, %v452_v17 }
 0x12d   : > { %v617_v58 = vpop.permute.xlu1 %616 }
 0x12e   : > { %v656_v59 = vmul.f32 %v1949_v52, %v617_v58 }
 0x130   : > { %v672_v50 = vadd.f32 %v656_v59, %v572_v51 }
 0x132   : > { %v521_v60 = vpop.permute.xlu1 %520 }
 0x137   : > { %v713_v53 = vpop.permute.xlu1 %712 }
 0x138   : > { %v755_v55 = vmul.f32 %v1954_v54, %v713_v53 }
 0x13a   : > { %v2060_v62 = vadd.f32 %v755_v55, %v671_v29  ;;  %v557_v29 = vmul.f32 %v1928_v35, %v521_v60 }
 0x13b   : > { %v717_v40 = vpop.permute.xlu1 %716 }
 0x13c   : > { %v756_v2 = vmul.f32 %v1954_v54, %v717_v40  ;;  %v573_v30 = vadd.f32 %v557_v29, %v473_v28 }
 0x13e   : > { %v2063_v3 = vadd.f32 %v756_v2, %v672_v50  ;;  %v574_v50 = vadd.f32 %v558_v1, %v474_v43  ;;  %v737_v2 = vpop.permute.xlu0 %736 }
 0x13f   : > { %v761_v57 = vmul.f32 %v1954_v54, %v737_v2 }
 0x140   : > { %v425_v56 = vpop.permute.xlu1 %424 }
 0x141   : > { %v454_v55 = vmul.f32 %v1919_v22, %v425_v56  ;;  %v784_v56 = vmax.f32 %v2037_v38, 0.0 }
 0x143   : > { %v476_v29 = vadd.f32 %v1933_v42, %v454_v55 }
 0x145   : > { %v621_v5 = vpop.permute.xlu1 %620 }
 0x146   : > { %v657_v61 = vmul.f32 %v1949_v52, %v621_v5 }
 0x148   : > { %v673_v40 = vadd.f32 %v657_v61, %v573_v30 }
 0x14a   : > { %v2065_v6 = vpop.permute.xlu1 %528 }
 0x14b   : > { %v559_v38 = vmul.f32 %v1928_v35, %v2065_v6 }
 0x14e   : > { %v2067_v8 = vpop.permute.xlu1 %532 }
 0x153   : > { %v725_v11 = vpop.permute.xlu1 %724 }
 0x154   : > { %v758_v10 = vmul.f32 %v1954_v54, %v725_v11  ;;  %v787_v11 = vmax.f32 %v2060_v62, 0.0 }
 0x158   : > { %v430_v24 = vpop.permute.xlu1 %429 }
 0x159   : > { %v455_v58 = vmul.f32 %v1919_v22, %v430_v24  ;;  %v2106_v24 = vmul.f32 %v1954_v54, %v733_v32  ;;  %v786_v22 = vmax.f32 %v2051_v37, 0.0  ;;  %v560_v37 = vmul.f32 %v1928_v35, %v2067_v8 }
 0x15b   : > { %v477_v18 = vadd.f32 %v1933_v42, %v455_v58 }
 0x15d   : > { %v2069_v12 = vpop.permute.xlu1 %628 }
 0x161   : > { %v2071_v13 = vpop.permute.xlu1 %632 }
 0x166   : > { %v2073_v44 = vpop.permute.xlu1 %540 }
 0x167   : > { %v562_v62 = vmul.f32 %v1928_v35, %v2073_v44  ;;  %v575_v35 = vadd.f32 %v559_v38, %v475_v36  ;;  %v576_v44 = vadd.f32 %v560_v37, %v476_v29  ;;  %v788_v36 = vmax.f32 %v2063_v3, 0.0 }
 0x168   : > { %v1055_v37 = vadd.s32 8, %v1896_v9 }
 0x16b   : > { %v2075_v15 = vpop.permute.xlu1 %728 }
 0x170   : > { %v637_v45 = vpop.permute.xlu1 %636 }
 0x173   : > { %v1478_v25 = vpop.f32.mrb[0].mxu0 }
 0x174   : > { %v975_v26 = vadd.f32 %v1478_v25, %v781_v20  ;;  %v966_v31 = vpop.f32.mrb[1].mxu0  ;;  %v641_v17 = vpop.permute.xlu1 %640 }
 0x175   : > { %v967_v19 = vadd.f32 %v966_v31, %v779_v41  ;;  %v1479_v47 = vpop.f32.mrb[2].mxu0  ;;  %v674_v41 = vadd.f32 %v658_v39, %v574_v50  ;;  %v661_v31 = vmul.f32 %v1949_v52, %v637_v45  ;;  %v659_v45 = vmul.f32 %v1949_v52, %v2069_v12 }
 0x176   : > { %v978_v49 = vadd.f32 %v1479_v47, %v782_v33  ;;  %v969_v51 = vpop.f32.mrb[3].mxu0  ;;  %v1031_v63 = vmax.f32 %v975_v26, 0.0  ;;  %v773_v26 = vadd.f32 %v757_v0, %v673_v40  ;;  %v577_v47 = vadd.f32 %v561_v16, %v477_v18 }
 0x177   : > { %v970_v4 = vadd.f32 %v969_v51, %v780_v27  ;;  %v1029_v60 = vmax.f32 %v967_v19, 0.0  ;;  %v774_v1 = vadd.f32 %v758_v10, %v674_v41  ;;  %v660_v39 = vmul.f32 %v1949_v52, %v2071_v13 }
 0x178   : > { %v1032_v59 = vmax.f32 %v978_v49, 0.0  ;;  %v677_v49 = vadd.f32 %v661_v31, %v577_v47  ;;  %v662_v8 = vmul.f32 %v1949_v52, %v641_v17  ;;  %v578_v13 = vadd.f32 %v562_v62, %v2096_v46  ;;  %v1065_v47 = vld [vmem:[#allocation2] sm:$0xff] }
 0x179   : > { %v1030_v53 = vmax.f32 %v970_v4, 0.0  ;;  %v741_v61 = vpop.permute.xlu1 %740  ;;  %v789_v4 = vmax.f32 %v773_v26, 0.0  ;;  %v790_v50 = vmax.f32 %v774_v1, 0.0  ;;  %v675_v0 = vadd.f32 %v659_v45, %v575_v35  ;;  %v1625_v35 = vld [vmem:[%s2240_s8 + $0x8] sm:$0xff] (!%p1416_p4)  }
 0x17a   : > { %v1046_v5 = vpack.c.bf16 %v1032_v59, %v1031_v63  ;;  %v762_v58 = vmul.f32 %v1954_v54, %v741_v61  ;;  %v676_v52 = vadd.f32 %v660_v39, %v576_v44  ;;  %v777_v55 = vadd.f32 %v761_v57, %v677_v49  ;;  %v1617_v49 = vld [vmem:[%s2238_s6 + $0x8] sm:$0xff] (!%p1416_p4)   ;;  %v1620_v44 = vld [vmem:[%s2238_s6 + $0x20] sm:$0xff] (!%p1416_p4)  }
 0x17b   : > { %v1482_v20 = vpop.f32.mrb[4].mxu0  ;;  %v1045_v21 = vpack.c.bf16 %v1030_v53, %v1029_v60  ;;  %v678_v40 = vadd.f32 %v662_v8, %v578_v13  ;;  %v1677_v62 = vmov 1.0|1.0   ;;  %v1618_v8 = vld [vmem:[%s2238_s6 + $0x10] sm:$0xff] (!%p1416_p4)   ;;  %v1117_v13 = vld [vmem:[%s2234_s2 + $0x8] sm:$0xff] (!%p1416_p4) }
 0x17c   : > { %v991_v23 = vadd.f32 %v1482_v20, %v785_v34  ;;  %v982_v25 = vpop.f32.mrb[5].mxu0  ;;  %v776_v10 = vadd.f32 %v2106_v24, %v676_v52  ;;  %v793_v18 = vmax.f32 %v777_v55, 0.0  ;;  %v1629_v55 = vld [vmem:[%s2240_s8 + $0x28] sm:$0xff] (!%p1416_p4)  }
 0x17d   : > { %v983_v14 = vadd.f32 %v982_v25, %v783_v48  ;;  %v1483_v28 = vpop.f32.mrb[6].mxu0  ;;  %1493 = vmatpush3.bf16.msra.mxu1 %v1045_v21  ;;  %v759_v48 = vmul.f32 %v1954_v54, %v2075_v15  ;;  %v778_v34 = vadd.f32 %v762_v58, %v678_v40  ;;  %v1630_v40 = vld [vmem:[%s2240_s8 + $0x30] sm:$0xff] (!%p1416_p4)  }
 0x17e   : > { %v994_v33 = vadd.f32 %v1483_v28, %v786_v22  ;;  %v985_v43 = vpop.f32.mrb[7].mxu0  ;;  %1494 = vmatprep.subr.bf16.mxu1 %v1672_v7  ;;  %v1035_v42 = vmax.f32 %v991_v23, 0.0  ;;  %v792_v28 = vmax.f32 %v776_v10, 0.0 }
 0x17f   : > { %v986_v19 = vadd.f32 %v985_v43, %v784_v56  ;;  %v1033_v32 = vmax.f32 %v983_v14, 0.0  ;;  %v794_v41 = vmax.f32 %v778_v34, 0.0 }
 0x180   : > { %v1036_v27 = vmax.f32 %v994_v33, 0.0 }
 0x181   : > { %v1034_v6 = vmax.f32 %v986_v19, 0.0  ;;  %1495 = vmatpush3.bf16.msra.mxu1 %v1046_v5  ;;  %v775_v5 = vadd.f32 %v759_v48, %v675_v0  ;;  %v1413_v19 = vld [vmem:[%s814_s15] ss:$0 sm:$0xff]  ;;  %v1621_v48 = vld [vmem:[%s2238_s6 + $0x28] sm:$0xff] (!%p1416_p4)   ;;  %v1623_v0 = vld [vmem:[%s2238_s6 + $0x38] sm:$0xff] (!%p1416_p4)  }
 0x182   : > { %v1048_v51 = vpack.c.bf16 %v1036_v27, %v1035_v42  ;;  %1496 = vmatprep.subr.bf16.mxu1 %v1672_v7  ;;  %vm1060_vm2 = vcmp.eq.s32.totalorder %v1896_v9, %v1413_v19  ;;  %vm1061_vm3 = vcmp.eq.s32.totalorder %v1055_v37, %v1413_v19  ;;  %v1066_v27 = vld [vmem:[#allocation2 + $0x8] sm:$0xff]  ;;  %v1678_v9 = vmov (!%p1416_p4), 0.0  }
 0x183   : > { %v1047_v12 = vpack.c.bf16 %v1034_v6, %v1033_v32  ;;  %v1486_v30 = vpop.f32.mrb[8].mxu0  ;;  %v791_v25 = vmax.f32 %v775_v5, 0.0  ;;  %vm1414_vm4 = vmpackc.low %vm1061_vm3, %vm1060_vm2  ;;  %1512 = vmatprep.subr.bf16.mxu0 (!%p1416_p4), %v1678_v9  ;;  %1528 = vmatprep.mubr.msk.bf16.mxu0 (!%p1416_p4), %vm1679_vm5, %v1678_v9 }
 0x184   : > { %v1007_v63 = vadd.f32 %v1486_v30, %v789_v4  ;;  %v998_v59 = vpop.f32.mrb[9].mxu0  ;;  %v1624_v4 = vld [vmem:[%s2240_s8] sm:$0xff] (!%p1416_p4)  }
 0x185   : > { %v999_v60 = vadd.f32 %v998_v59, %v787_v11  ;;  %v1487_v53 = vpop.f32.mrb[10].mxu0  ;;  %1497 = vmatpush3.bf16.msra.mxu1 %v1047_v12  ;;  %v1622_v12 = vld [vmem:[%s2238_s6 + $0x30] sm:$0xff] (!%p1416_p4)   ;;  %v1116_v30 = vld [vmem:[%s2234_s2] sm:$0xff] (!%p1416_p4) }
 0x186   : > { %v1010_v2 = vadd.f32 %v1487_v53, %v790_v50  ;;  %v1001_v15 = vpop.f32.mrb[11].mxu0  ;;  %1498 = vmatprep.subr.bf16.mxu1 %v1672_v7  ;;  %v1039_v54 = vmax.f32 %v1007_v63, 0.0  ;;  %v1627_v53 = vld [vmem:[%s2240_s8 + $0x18] sm:$0xff] (!%p1416_p4)  }
 0x187   : > { %v1002_v46 = vadd.f32 %v1001_v15, %v788_v36  ;;  %v1037_v17 = vmax.f32 %v999_v60, 0.0  ;;  %v1626_v60 = vld [vmem:[%s2240_s8 + $0x10] sm:$0xff] (!%p1416_p4)   ;;  %v1628_v36 = vld [vmem:[%s2240_s8 + $0x20] sm:$0xff] (!%p1416_p4)  }
 0x188   : > { %v1040_v16 = vmax.f32 %v1010_v2, 0.0  ;;  %v1631_v2 = vld [vmem:[%s2240_s8 + $0x38] sm:$0xff] (!%p1416_p4)   ;;  %v1417_v15 = vld [vmem:[%s2239_s7] ss:$0 sm:$0xff] (!%p1416_p4) }
 0x189   : > { %v1038_v20 = vmax.f32 %v1002_v46, 0.0  ;;  %1499 = vmatpush3.bf16.msra.mxu1 %v1048_v51  ;;  %v1619_v51 = vld [vmem:[%s2238_s6 + $0x18] sm:$0xff] (!%p1416_p4)  }
 0x18a   : > { %v1050_v21 = vpack.c.bf16 %v1040_v16, %v1039_v54  ;;  %1500 = vmatprep.subr.bf16.mxu1 %v1672_v7 }
 0x18b   : > { %v1049_v3 = vpack.c.bf16 %v1038_v20, %v1037_v17  ;;  %v1490_v23 = vpop.f32.mrb[12].mxu0 }
 0x18c   : > { %v1023_v22 = vadd.f32 %v1490_v23, %v793_v18  ;;  %v1014_v56 = vpop.f32.mrb[13].mxu0 }
 0x18d   : > { %v1015_v57 = vadd.f32 %v1014_v56, %v791_v25  ;;  %v1491_v14 = vpop.f32.mrb[14].mxu0  ;;  %1501 = vmatpush3.bf16.msra.mxu1 %v1049_v3 }
 0x18e   : > { %v1026_v24 = vadd.f32 %v1491_v14, %v794_v41  ;;  %v1017_v11 = vpop.f32.mrb[15].mxu0  ;;  %1502 = vmatprep.subr.bf16.mxu1 %v1672_v7  ;;  %v1043_v26 = vmax.f32 %v1023_v22, 0.0  ;;  %v1270_v14 = vld [vmem:[%s2241_s9] sm:$0x1] (!%p1416_p4) }
 0x18f   : > { %v1018_v29 = vadd.f32 %v1017_v11, %v792_v28  ;;  %v1041_v33 = vmax.f32 %v1015_v57, 0.0 }
 0x190   : > { %v1044_v31 = vmax.f32 %v1026_v24, 0.0 }
 0x191   : > { %v1042_v43 = vmax.f32 %v1018_v29, 0.0  ;;  %1503 = vmatpush3.bf16.msra.mxu1 %v1050_v21 }
 0x192   : > { %v1052_v38 = vpack.c.bf16 %v1044_v31, %v1043_v26  ;;  %1504 = vmatprep.subr.bf16.mxu1 %v1672_v7 }
 0x193   : > { %v1051_v1 = vpack.c.bf16 %v1042_v43, %v1041_v33 }
 0x195   : > { %1505 = vmatpush3.bf16.msra.mxu1 %v1051_v1 }
 0x196   : > { %1506 = vmatprep.subr.bf16.mxu1 %v1672_v7  ;;  %v1616_v7 = vld [vmem:[%s2238_s6] sm:$0xff] (!%p1416_p4)  }
 0x197   : > { %1513 = vmatpush3.bf16.msra.mxu0 (!%p1416_p4), %v1616_v7 }
 0x198   : > { %1514 = vmatprep.subr.bf16.mxu0 (!%p1416_p4), %v1678_v9 }
 0x199   : > { %1507 = vmatpush3.bf16.msra.mxu1 %v1052_v38 }
 0x19a   : > { %1532 = vmatprep.subr.bf16.mxu1 (!%p1416_p4), %v1678_v9 }
 0x19b   : > { %1515 = vmatpush3.bf16.msra.mxu0 (!%p1416_p4), %v1617_v49 }
 0x19c   : > { %1509 = vmatmul.mubr.msk.bf16.vlgmr.msra.gmra.mrb[0].mxu1 %vm1414_vm4, %v1677_v62  ;;  %1516 = vmatprep.subr.bf16.mxu0 (!%p1416_p4), %v1678_v9 }
 0x19d   : > { %1548 = vmatprep.mubr.msk.bf16.mxu1 (!%p1416_p4), %vm1679_vm5, %v1678_v9  ;;  %1533 = vmatpush3.bf16.msra.mxu1 (!%p1416_p4), %v1624_v4 }
 0x19e   : > { %1534 = vmatprep.subr.bf16.mxu1 (!%p1416_p4), %v1678_v9 }
 0x19f   : > { %1517 = vmatpush3.bf16.msra.mxu0 (!%p1416_p4), %v1618_v8 }
 0x1a0   : > { %1518 = vmatprep.subr.bf16.mxu0 (!%p1416_p4), %v1678_v9 }
 0x1a1   : > { %1535 = vmatpush3.bf16.msra.mxu1 (!%p1416_p4), %v1625_v35 }
 0x1a2   : > { %1536 = vmatprep.subr.bf16.mxu1 (!%p1416_p4), %v1678_v9 }
 0x1a3   : > { %1519 = vmatpush3.bf16.msra.mxu0 (!%p1416_p4), %v1619_v51 }
 0x1a4   : > { %1520 = vmatprep.subr.bf16.mxu0 (!%p1416_p4), %v1678_v9 }
 0x1a5   : > { %1537 = vmatpush3.bf16.msra.mxu1 (!%p1416_p4), %v1626_v60 }
 0x1a6   : > { %1538 = vmatprep.subr.bf16.mxu1 (!%p1416_p4), %v1678_v9 }
 0x1a7   : > { %1521 = vmatpush3.bf16.msra.mxu0 (!%p1416_p4), %v1620_v44 }
 0x1a8   : > { %1522 = vmatprep.subr.bf16.mxu0 (!%p1416_p4), %v1678_v9 }
 0x1a9   : > { %1539 = vmatpush3.bf16.msra.mxu1 (!%p1416_p4), %v1627_v53 }
 0x1aa   : > { %1540 = vmatprep.subr.bf16.mxu1 (!%p1416_p4), %v1678_v9 }
 0x1ab   : > { %1523 = vmatpush3.bf16.msra.mxu0 (!%p1416_p4), %v1621_v48 }
 0x1ac   : > { %1524 = vmatprep.subr.bf16.mxu0 (!%p1416_p4), %v1678_v9 }
 0x1ad   : > { %1541 = vmatpush3.bf16.msra.mxu1 (!%p1416_p4), %v1628_v36 }
 0x1ae   : > { %1542 = vmatprep.subr.bf16.mxu1 (!%p1416_p4), %v1678_v9 }
 0x1af   : > { %1525 = vmatpush3.bf16.msra.mxu0 (!%p1416_p4), %v1622_v12 }
 0x1b0   : > { %1526 = vmatprep.subr.bf16.mxu0 (!%p1416_p4), %v1678_v9 }
 0x1b1   : > { %1543 = vmatpush3.bf16.msra.mxu1 (!%p1416_p4), %v1629_v55 }
 0x1b2   : > { %1544 = vmatprep.subr.bf16.mxu1 (!%p1416_p4), %v1678_v9 }
 0x1b3   : > { %1527 = vmatpush3.bf16.msra.mxu0 (!%p1416_p4), %v1623_v0 }
 0x1b5   : > { %1545 = vmatpush3.bf16.msra.mxu1 (!%p1416_p4), %v1630_v40 }
 0x1b6   : > { %1546 = vmatprep.subr.bf16.mxu1 (!%p1416_p4), %v1678_v9 }
 0x1b9   : > { %1547 = vmatpush3.bf16.msra.mxu1 (!%p1416_p4), %v1631_v2 }
 0x26e   : > { %1115 = sbr.rel (%p1416_p4) target bundleno = 1091 (0x443), region = 68 }
 0x26f   : > { %v1101_v42 = vpop.f32.mrb[0].mxu1 }
 0x270   : > { %v1108_v45 = vadd.f32 %v1101_v42, %v1065_v47  ;;  %v1510_v39 = vpop.f32.mrb[1].mxu1 }
 0x271   : > { %v1104_v61 = vpop.f32.mrb[2].mxu1 }
 0x272   : > { %1110 = vst [vmem:[#allocation2] sm:$0xff] %v1108_v45  ;;  %v1109_v32 = vadd.f32 %v1104_v61, %v1066_v27  ;;  %v1511_v6 = vpop.f32.mrb[3].mxu1 }
 0x274   : > { %1111 = vst [vmem:[#allocation2 + $0x8] sm:$0xff] %v1109_v32 }
 0x279   : > { %v1118_v58 = vld [vmem:[#allocation2] sm:$0xff] }
 0x27a   : > { %v1120_v59 = vadd.f32 %v1118_v58, %v1116_v30 }
 0x27b   : > { %v1119_v63 = vld [vmem:[#allocation2 + $0x8] sm:$0xff] }
 0x27c   : > { %v1121_v50 = vadd.f32 %v1119_v63, %v1117_v13 }
 0x27e   : > { %v1122_v52 = vpack.c.bf16 %v1121_v50, %v1120_v59 }
 0x280   : > { %1529 = vmatmul.mubr.bf16.vlgmr.msra.gmra.mrb[0].mxu0 %v1122_v52 }
 0x353   : > { %v1228_v5 = vpop.f32.mrb[0].mxu0 }
 0x354   : > { %v1229_v46 = vadd.f32 %v1417_v15, %v1228_v5  ;;  %v1530_v34 = vpop.f32.mrb[1].mxu0 }
 0x355   : > { %v1231_v54 = vpop.f32.mrb[2].mxu0 }
 0x356   : > { %v1232_v16 = vadd.f32 %v1417_v15, %v1231_v54  ;;  %v1531_v10 = vpop.f32.mrb[3].mxu0  ;;  %v1235_v17 = vmax.f32 %v1229_v46, 0.0 }
 0x358   : > { %v1236_v20 = vmax.f32 %v1232_v16, 0.0 }
 0x35a   : > { %v1245_v21 = vadd.f32 %v1236_v20, %v1235_v17 }
 0x35c   : > { %v1246_v18 = vrot.slane %v1245_v21, 4 }
 0x35e   : > { %v1247_v3 = vadd.f32 %v1246_v18, %v1245_v21 }
 0x360   : > { %v1248_v23 = vrot.slane %v1247_v3, 2 }
 0x362   : > { %v1249_v25 = vadd.f32 %v1248_v23, %v1247_v3 }
 0x364   : > { %v1250_v22 = vrot.slane %v1249_v25, 1 }
 0x366   : > { %v1251_v56 = vadd.f32 %v1250_v22, %v1249_v25 }
 0x368   : > { %v1252_v41 = vmul.f32 0.0625, %v1251_v56 }
 0x36a   : > { %v1253_v57 = vpack.c.bf16 %v1252_v41, %v1252_v41 }
 0x36c   : > { %1549 = vmatmul.mubr.bf16.vlgmr.msra.gmra.mrb[0].mxu1 %v1253_v57 }
 0x43f   : > { %v1353_v28 = vpop.f32.mrb[0].mxu1 }
 0x440   : > { %v1354_v24 = vadd.f32 %v1353_v28, %v1270_v14  ;;  %v1550_v11 = vpop.f32.mrb[1].mxu1 }
 0x441   : > { %v1356_v29 = vpop.f32.mrb[2].mxu1 }
 0x442   : > { %1359 = vst [vmem:[#allocation4] sm:$0x1] %v1354_v24  ;;  %v1551_v26 = vpop.f32.mrb[3].mxu1 }
 0x443 PF: > { %p1556_p5 = scmp.eq.s32.totalorder %s1742_s14, 2  ;;  %s1680_s20 = smov [#allocation4]  }
 0x444   : > { %s1367_s21 = sshll.u32 %s1680_s20, 4  ;;  %s1368_s21 = int_to_ptr.vmem [resolvable:$true] %s1367_s21 }
 0x445   : > { %s1632_s22 = scalar_lea.vmem %s1368_s21, 16  ;;  %s1638_s23 = scalar_lea.vmem %s1368_s21, 32 }
 0x446   : > { %p1633_p6 = scmp.ne.s32.totalorder %s1368_s21, %s1632_s22  ;;  %p1639_p9 = scmp.lt.s32.totalorder %s1368_s21, %s1368_s21 }
 0x447   : > { %p1640_p10 = scmp.lt.s32.totalorder %s1638_s23, %s1632_s22 }
 0x448   : > { %p1634_p7 = pnand %p1633_p6, %p1556_p5 }
 0x449   : > { %p1641_p11 = por %p1640_p10, %p1639_p9 }
 0x44a   : > { %p1635_p8 = pneg %p1634_p7 }
 0x44c   : > { %p1642_p12 = pnand %p1641_p11, %p1635_p8 }
 0x44e   : > { %1645 = shalt.err (!%p1642_p12)
}
 0x44f   : > { %s1646_s26 = scalar_lea.hbm %s2242_s10, 16 }
 0x450   : > { %p1647_p13 = scmp.ne.s32.totalorder %s2242_s10, %s1646_s26  ;;  %p1652_p2 = scmp.lt.u32.totalorder %s1646_s26, %s2242_s10 }
 0x452   : > { %p1648_p0 = pnand %p1647_p13, %p1556_p5 }
 0x454   : > { %p1649_p1 = pneg %p1648_p0 }
 0x456   : > { %p1654_p3 = pnand %p1652_p2, %p1649_p1 }
 0x458   : > { %1657 = shalt.err (!%p1654_p3)
}
 0x459   : > { %1553 = dma.vmem_to_hbm [thread:$0]  (%p1556_p5), %s1368_s21, 16, %s2242_s10, [#allocation5]  }
 0x45a   : > { %1663 = dma.done.wait (%p1556_p5), [#allocation5], 16  }
 0x45b   : > { %1665 = vsyncadd (%p1556_p5), [#allocation5], 4294967280 }
 0x45c PF: > { %s21_s13 = sadd.s32 1, %s1668_s13  }
 0x45d   : > { %p18_p4 = scmp.ge.s32.totalorder %s21_s13, 5  }
 0x45f   :  { %20 = sbr.rel (!%p18_p4) target bundleno = 1 (0x1), region = 95 }
 0x466   :  { %1380 = vsyncpa [#allocation5], 1 }
 0x467   :  { %1382 = vsyncpa [#allocation5 + $0x1], 1 }

</bundles_post_ra>
